<compile_context>
chip_gen: v7x
topology: tpu7x:2x2x1
jax: 0.10.0
libtpu: 0.0.40
codegen_flags: <defaults>
</compile_context>

<pallas_src>
import jax
import jax.numpy as jnp
from jax.experimental import pallas as pl
from jax.experimental.pallas import tpu as pltpu

_LANE = 128
_SUBLANE = 8
# Per-input-block byte budget: 2 inputs x 2 pipeline buffers x 4 MiB = 16 MiB,
# comfortably inside the 32 MiB scoped limit we request below on every chip.
_BLOCK_BYTES_BUDGET = 4 * 1024 * 1024
_VMEM_LIMIT_BYTES = 32 * 1024 * 1024


def _cdiv(a: int, b: int) -> int:
    return (a + b - 1) // b


def _pick_row_tile(n_rows: int, n_cols: int, dtype_bytes: int,
                   budget: int = _BLOCK_BYTES_BUDGET) -> int:
    """Largest sublane-aligned row tile whose block fits the VMEM budget."""
    rows_budget = max(_SUBLANE,
                      (budget // (n_cols * dtype_bytes)) // _SUBLANE * _SUBLANE)
    rows_needed = _cdiv(n_rows, _SUBLANE) * _SUBLANE
    return min(rows_budget, rows_needed)


# ---------------------------------------------------------------------------
# Forward: BaseModel.forward is abstract -> identity pass-through.
# ---------------------------------------------------------------------------
def base_model_forward(x):
    # TODO(synk): BaseModel.forward is abstract (`pass`); identity is the only
    # faithful concrete semantics.  Returning x avoids a pointless full
    # HBM read+write pass.
    return x


def _identity_copy_kernel(x_ref, o_ref):
    o_ref[...] = x_ref[...]


def base_model_forward_materialized(x):
    """Identity forward as an explicit Pallas copy (only when a kernel boundary
    is required); tiled with large, VMEM-budgeted row blocks."""
    B, F = x.shape
    dtype_bytes = jnp.dtype(x.dtype).itemsize
    row_tile = _pick_row_tile(B, F, dtype_bytes)
    steps = _cdiv(B, row_tile)
    B_pad = steps * row_tile
    xp = jnp.pad(x, ((0, B_pad - B), (0, 0))) if B_pad != B else x

    y = pl.pallas_call(
        _identity_copy_kernel,
        out_shape=jax.ShapeDtypeStruct((B_pad, F), x.dtype),
        grid_spec=pltpu.PrefetchScalarGridSpec(
            num_scalar_prefetch=0,
            grid=(steps,),
            in_specs=[pl.BlockSpec((row_tile, F), lambda i: (i, 0))],
            out_specs=pl.BlockSpec((row_tile, F), lambda i: (i, 0)),
        ),
        compiler_params=pltpu.CompilerParams(
            dimension_semantics=("parallel",),
            vmem_limit_bytes=_VMEM_LIMIT_BYTES,
        ),
    )(xp)
    return y[:B] if B_pad != B else y


# ---------------------------------------------------------------------------
# MSE metric (what fit() evaluates/prints), fused with the identity forward:
# reads pred/target straight from HBM once, accumulates a vector partial sum
# per split, combines partials + divides in the wrapper.
# ---------------------------------------------------------------------------
def _mse_partial_kernel(pred_ref, tgt_ref, o_ref, acc_ref):
    i = pl.program_id(1)

    @pl.when(i == 0)
    def _():
        acc_ref[...] = jnp.zeros_like(acc_ref)

    p = pred_ref[...]
    t = tgt_ref[...]
    if p.dtype != jnp.float32:          # only cast for non-f32 (e.g. bf16) inputs
        p = p.astype(jnp.float32)
        t = t.astype(jnp.float32)
    d = p - t
    sq = d * d                          # (row_tile, F)
    rt, F = sq.shape
    # Reduce the sublane-group axis only: pure vreg adds on the VPU; the
    # cross-lane/sublane reduction is deferred to the wrapper (one shot).
    acc_ref[...] += jnp.sum(sq.reshape(rt // _SUBLANE, _SUBLANE, F), axis=0)

    @pl.when(i == pl.num_programs(1) - 1)
    def _():
        o_ref[0] = acc_ref[...]


def base_model_mse(pred, target, *, num_splits=2):
    """mean((pred - target)**2), computed with a Pallas reduction kernel.

    num_splits=2 adds a leading 'parallel' grid axis so the memory-bound
    reduction can shard across the two TensorCores on v7x (no-op on v5e/v6e).
    """
    assert pred.shape == target.shape
    B, F = pred.shape
    assert F % _LANE == 0, "feature dim must be a multiple of 128"
    n_total = B * F

    dtype_bytes = jnp.dtype(pred.dtype).itemsize
    row_tile = _pick_row_tile(_cdiv(B, num_splits), F, dtype_bytes)
    steps = _cdiv(B, num_splits * row_tile)
    B_pad = num_splits * steps * row_tile
    if B_pad != B:
        # Zero padding contributes 0 to the sum of squared differences.
        pad = B_pad - B
        pred = jnp.pad(pred, ((0, pad), (0, 0)))
        target = jnp.pad(target, ((0, pad), (0, 0)))

    partials = pl.pallas_call(
        _mse_partial_kernel,
        out_shape=jax.ShapeDtypeStruct((num_splits, _SUBLANE, F), jnp.float32),
        grid_spec=pltpu.PrefetchScalarGridSpec(
            num_scalar_prefetch=0,
            grid=(num_splits, steps),
            in_specs=[
                pl.BlockSpec((row_tile, F), lambda s, i: (s * steps + i, 0)),
                pl.BlockSpec((row_tile, F), lambda s, i: (s * steps + i, 0)),
            ],
            out_specs=pl.BlockSpec((1, _SUBLANE, F), lambda s, i: (s, 0, 0)),
            scratch_shapes=[pltpu.VMEM((_SUBLANE, F), jnp.float32)],
        ),
        compiler_params=pltpu.CompilerParams(
            dimension_semantics=("parallel", "arbitrary"),
            vmem_limit_bytes=_VMEM_LIMIT_BYTES,
        ),
    )(pred, target)
    # Single final cross-split / cross-lane / cross-sublane reduce + divide.
    return jnp.sum(partials) / jnp.float32(n_total)


# TODO(synk): fit()'s training loop / optimizer step, Writer logging, and
# save()/load() checkpoint IO are host-side orchestration with no Pallas
# equivalent and are intentionally not translated.


if __name__ == "__main__":
    key = jax.random.PRNGKey(0)
    k1, k2 = jax.random.split(key)

    # Small demo shapes: batch=16, features=128 (lane-aligned), float32.
    B, F = 16, 128
    x = jax.random.normal(k1, (B, F), dtype=jnp.float32)
    target = jax.random.normal(k2, (B, F), dtype=jnp.float32)

    # Abstract forward: identity pass-through (zero-cost).
    y = base_model_forward(x)
    assert y.shape == x.shape and y.dtype == x.dtype

    # Explicit Pallas copy path (exercised once for completeness).
    y_mat = jax.block_until_ready(base_model_forward_materialized(x))
    assert jnp.array_equal(y_mat, x), "identity forward mismatch"

    # Fused forward + MSE: forward is identity, so the MSE kernel reads the
    # activations directly -- no intermediate HBM writeback of y.
    mse = jax.block_until_ready(base_model_mse(y, target))
    mse_ref = jnp.mean((x - target) ** 2)
    assert jnp.allclose(mse, mse_ref, rtol=1e-5, atol=1e-6), (mse, mse_ref)

    print("KERNEL_OK")
</pallas_src>

<mosaic_0001>
module attributes {stable_mosaic.version = 11 : i64} {
  func.func @_identity_copy_kernel(%arg0: i32, %arg1: memref<16x128xf32, #tpu.memory_space<vmem>>, %arg2: memref<16x128xf32, #tpu.memory_space<vmem>>) attributes {dimension_semantics = [#tpu.dimension_semantics<parallel>], iteration_bounds = array<i64: 1>, scalar_prefetch = 0 : i64, scratch_operands = 0 : i64, tpu.core_type = #tpu.core_type<tc>, window_params = [{transform_indices = @transform_0, window_bounds = array<i64: 16, 128>}, {transform_indices = @transform_1, window_bounds = array<i64: 16, 128>}]} {
    %c0 = arith.constant 0 : index
    %c0_0 = arith.constant 0 : index
    %0 = vector.load %arg1[%c0, %c0_0] : memref<16x128xf32, #tpu.memory_space<vmem>>, vector<16x128xf32>
    %c0_1 = arith.constant 0 : index
    %c0_2 = arith.constant 0 : index
    %1 = vector.load %arg2[%c0_1, %c0_2] : memref<16x128xf32, #tpu.memory_space<vmem>>, vector<16x128xf32>
    tpu.vector_store %arg2[%c0_1, %c0_2], %0 {strides = array<i32>} : memref<16x128xf32, #tpu.memory_space<vmem>>, vector<16x128xf32>,
    return
  }
  func.func @transform_0(%arg0: i32) -> (i32, i32) {
    %c0_i32 = arith.constant 0 : i32
    %c0_i32_0 = arith.constant 0 : i32
    return %arg0, %c0_i32 : i32, i32
  }
  func.func @transform_1(%arg0: i32) -> (i32, i32) {
    %c0_i32 = arith.constant 0 : i32
    %c0_i32_0 = arith.constant 0 : i32
    return %arg0, %c0_i32 : i32, i32
  }
}

</mosaic_0001>

<bundles_post_ra>
// kernel: tpu_custom_call.1
= control target key start
LH: loop header
LB: loop body
LE: loop exit
PB: predicated region body
PF: predicated region fallthrough
CT: control target
= control target key end

     0   :  { %6 = vsyncpa [#allocation3], 0  ;;  %s134_s0 = inlined_call_operand.hbm [shape: f32[16,128], index: 0, kind: input, shape index: {}]   ;;  %s135_s1 = inlined_call_operand.hbm [shape: f32[16,128], index: 1, kind: output, shape index: {}]  }
   0x1   :  { %7 = vsyncpa [#allocation4], 0  ;;  %s96_s6 = smov [#allocation2]   ;;  %s48_s10 = scalar_lea.hbm %s134_s0, 256 }
   0x2   :  { %s13_s7 = sshll.u32 %s96_s6, 4  ;;  %p49_p0 = scmp.ne.s32.totalorder %s134_s0, %s48_s10  ;;  %s14_s7 = int_to_ptr.vmem [resolvable:$true] %s13_s7 }
   0x3   :  { %p52_p1 = scmp.lt.u32.totalorder %s48_s10, %s134_s0 }
   0x5   :  { %p54_p2 = pnand %p52_p1, %p49_p0 }
   0x7   :  { %57 = shalt.err (!%p54_p2)
}
   0x8   :  { %s58_s15 = scalar_lea.vmem %s14_s7, 256  ;;  %p63_p4 = scmp.lt.s32.totalorder %s14_s7, %s14_s7 }
   0x9   :  { %p59_p3 = scmp.ne.s32.totalorder %s14_s7, %s58_s15  ;;  %p64_p5 = scmp.lt.s32.totalorder %s58_s15, %s58_s15 }
   0xb   :  { %p65_p6 = por %p64_p5, %p63_p4 }
   0xd   :  { %p66_p7 = pnand %p65_p6, %p59_p3 }
   0xf   :  { %69 = shalt.err (!%p66_p7)
}
  0x10   :  { %s97_s16 = smov 128   ;;  %s98_s17 = smov 8  }
  0x11   :  { %19 = dma.hbm_to_vmem [thread:$0]  %s134_s0, 256, %s14_s7, [#allocation3], %s97_s16, %s97_s16, %s98_s17  }
  0x12   :  { %92 = dma.done.wait [#allocation3], 256  }
  0x13   :  { %93 = vsyncadd [#allocation3], 4294967040  ;;  %s99_s20 = smov [#allocation5]   ;;  %v23_v0 = vld [vmem:[#allocation2] sm:$0xff]  ;;  %v24_v1 = vld [vmem:[#allocation2 + $0x8] sm:$0xff] }
  0x14   :  { %s32_s21 = sshll.u32 %s99_s20, 4  ;;  %25 = vst [vmem:[#allocation5] sm:$0xff] %v23_v0  ;;  %26 = vst [vmem:[#allocation5 + $0x8] sm:$0xff] %v24_v1  ;;  %s33_s21 = int_to_ptr.vmem [resolvable:$true] %s32_s21 }
  0x15   :  { %s70_s22 = scalar_lea.vmem %s33_s21, 256  ;;  %p75_p9 = scmp.lt.s32.totalorder %s33_s21, %s33_s21 }
  0x16   :  { %p71_p8 = scmp.ne.s32.totalorder %s33_s21, %s70_s22  ;;  %p76_p10 = scmp.lt.s32.totalorder %s70_s22, %s70_s22 }
  0x18   :  { %p77_p11 = por %p76_p10, %p75_p9 }
  0x1a   :  { %p78_p12 = pnand %p77_p11, %p71_p8 }
  0x1c   :  { %81 = shalt.err (!%p78_p12)
}
  0x1d   :  { %s82_s0 = scalar_lea.hbm %s135_s1, 256 }
  0x1e   :  { %p83_p13 = scmp.ne.s32.totalorder %s135_s1, %s82_s0  ;;  %p86_p0 = scmp.lt.u32.totalorder %s82_s0, %s135_s1 }
  0x20   :  { %p88_p1 = pnand %p86_p0, %p83_p13 }
  0x22   :  { %91 = shalt.err (!%p88_p1)
}
  0x23   :  { %38 = dma.vmem_to_hbm [thread:$0]  %s33_s21, 256, %s135_s1, [#allocation4], %s97_s16, %s97_s16, %s98_s17  }
  0x24   :  { %94 = dma.done.wait [#allocation4], 256  }
  0x25   :  { %95 = vsyncadd [#allocation4], 4294967040 }
  0x26   :  { %42 = vsyncpa [#allocation3], 1 }
  0x27   :  { %43 = vsyncpa [#allocation4], 1 }

</bundles_post_ra>
